<compile_context>
chip_gen: v5e
topology: v5e:2x2
jax: 0.10.0
libtpu: 0.0.40
codegen_flags: <defaults>
</compile_context>

<pallas_src>
import jax
import jax.numpy as jnp
from jax.experimental import pallas as pl
from jax.experimental.pallas import tpu as pltpu


def _double_conv_kernel(x_ref, w1_ref, s1_ref, b1_ref,
                        w2_ref, s2_ref, b2_ref, o_ref):
    """One batch element, fully fused DoubleConv.

    x_ref:  (H, W*Cin)            lane-dense activation (channels in lanes)
    w1_ref: (3, W*Cin,  W*Cmid)   banded conv1 weights (kx taps + W-padding folded in)
    s1/b1:  (1, W*Cmid)           folded conv-bias+BN scale / shift, tiled over W
    w2_ref: (3, W*Cmid, W*Cout)   banded conv2 weights
    s2/b2:  (1, W*Cout)
    o_ref:  (H, W*Cout)           lane-dense output (W*Cout >= 128 => unmasked vst)
    """
    H = x_ref.shape[0]

    def conv_bn_relu(xp_f32, w_ref, s_ref, b_ref):
        # xp_f32: (H+2, K) row-padded activation (f32). 3 matmuls, one per ky,
        # bf16 operands -> f32 accumulation on the MXU.
        n = w_ref.shape[-1]
        acc = jnp.zeros((H, n), jnp.float32)
        for ky in range(3):  # static unroll
            lhs = xp_f32[ky:ky + H, :].astype(jnp.bfloat16)
            acc += jnp.dot(lhs, w_ref[ky],
                           preferred_element_type=jnp.float32)
        y = acc * s_ref[...] + b_ref[...]      # fused conv-bias + BN (eval mode)
        return jnp.maximum(y, 0.0)             # ReLU

    # ---- conv1 + BN + ReLU ----
    x = x_ref[...].astype(jnp.float32)                         # (H, W*Cin)
    zr1 = jnp.zeros((1, x.shape[1]), jnp.float32)
    xp1 = jnp.concatenate([zr1, x, zr1], axis=0)               # (H+2, W*Cin)
    h1 = conv_bn_relu(xp1, w1_ref, s1_ref, b1_ref)             # (H, W*Cmid) f32

    # ---- conv2 + BN + ReLU (mid activation never leaves the kernel) ----
    zr2 = jnp.zeros((1, h1.shape[1]), jnp.float32)
    xp2 = jnp.concatenate([zr2, h1, zr2], axis=0)              # (H+2, W*Cmid)
    y = conv_bn_relu(xp2, w2_ref, s2_ref, b2_ref)              # (H, W*Cout) f32

    o_ref[...] = y.astype(o_ref.dtype)


def _make_banded_weight(w_hwio, W, dtype=jnp.bfloat16):
    """(3, 3, Cin, Cout) -> (3, W*Cin, W*Cout).

    wb[ky, wi*Cin+ci, wo*Cout+co] = w[ky, kx=wi-wo+1, ci, co] if |wi-wo| <= 1 else 0,
    i.e. the kx taps and the W-direction zero padding are folded into the rhs so the
    conv becomes 3 well-shaped 2-D matmuls on lane-dense activations.
    """
    KH, KW, Cin, Cout = w_hwio.shape
    wi = jnp.arange(W)[:, None]                 # input column
    wo = jnp.arange(W)[None, :]                 # output column
    kx = wi - wo + 1                            # tap index, valid in [0, KW)
    valid = (kx >= 0) & (kx < KW)
    taps = w_hwio[:, jnp.clip(kx, 0, KW - 1), :, :]            # (KH, W, W, Cin, Cout)
    taps = taps * valid[None, :, :, None, None]
    wb = jnp.transpose(taps, (0, 1, 3, 2, 4)).reshape(KH, W * Cin, W * Cout)
    return wb.astype(dtype)


def _fold_bn(bias, gamma, beta, mean, var, W, eps=1e-5):
    """Conv bias + eval-mode BN -> per-lane scale/shift rows tiled over W."""
    scale = gamma / jnp.sqrt(var + eps)                        # (C,)
    shift = (bias - mean) * scale + beta                       # (C,)
    return (jnp.tile(scale, W)[None, :].astype(jnp.float32),   # (1, W*C)
            jnp.tile(shift, W)[None, :].astype(jnp.float32))


def double_conv_forward(params, x_nchw, eps=1e-5):
    """Equivalent of DoubleConv.forward with eval-mode BN. x: (N, Cin, H, W)."""
    N, Cin, H, W = x_nchw.shape
    Cmid = params['w1'].shape[-1]
    Cout = params['w2'].shape[-1]

    # NCHW -> NHWC -> lane-dense 2-D per image: (N, H, W*Cin)
    x2 = jnp.transpose(x_nchw, (0, 2, 3, 1)).reshape(N, H, W * Cin)

    w1b = _make_banded_weight(params['w1'], W)
    w2b = _make_banded_weight(params['w2'], W)
    s1, b1 = _fold_bn(params['b1'], params['g1'], params['be1'],
                      params['m1'], params['v1'], W, eps)
    s2, b2 = _fold_bn(params['b2'], params['g2'], params['be2'],
                      params['m2'], params['v2'], W, eps)

    out2 = pl.pallas_call(
        _double_conv_kernel,
        out_shape=jax.ShapeDtypeStruct((N, H, W * Cout), x_nchw.dtype),
        grid_spec=pltpu.PrefetchScalarGridSpec(
            num_scalar_prefetch=0,
            grid=(N,),
            in_specs=[
                pl.BlockSpec((None, H, W * Cin), lambda n: (n, 0, 0)),
                pl.BlockSpec((3, W * Cin, W * Cmid), lambda n: (0, 0, 0)),
                pl.BlockSpec((1, W * Cmid), lambda n: (0, 0)),
                pl.BlockSpec((1, W * Cmid), lambda n: (0, 0)),
                pl.BlockSpec((3, W * Cmid, W * Cout), lambda n: (0, 0, 0)),
                pl.BlockSpec((1, W * Cout), lambda n: (0, 0)),
                pl.BlockSpec((1, W * Cout), lambda n: (0, 0)),
            ],
            out_specs=pl.BlockSpec((None, H, W * Cout), lambda n: (n, 0, 0)),
        ),
        compiler_params=pltpu.CompilerParams(
            dimension_semantics=("parallel",)),
    )(x2, w1b, s1, b1, w2b, s2, b2)

    # (N, H, W*Cout) -> (N, H, W, Cout) -> NCHW
    return jnp.transpose(out2.reshape(N, H, W, Cout), (0, 3, 1, 2))


def _reference_forward(params, x_nchw, eps=1e-5):
    """Pure-JAX (f32) reference of the PyTorch module in eval mode."""
    def conv_bn_relu(x, w, b, g, be, m, v):
        y = jax.lax.conv_general_dilated(
            x, w, window_strides=(1, 1), padding=((1, 1), (1, 1)),
            dimension_numbers=('NCHW', 'HWIO', 'NCHW'))
        y = y + b[None, :, None, None]
        y = (y - m[None, :, None, None]) * (
            g[None, :, None, None] / jnp.sqrt(v[None, :, None, None] + eps))
        y = y + be[None, :, None, None]
        return jnp.maximum(y, 0.0)

    h = conv_bn_relu(x_nchw, params['w1'], params['b1'], params['g1'],
                     params['be1'], params['m1'], params['v1'])
    return conv_bn_relu(h, params['w2'], params['b2'], params['g2'],
                        params['be2'], params['m2'], params['v2'])


def init_double_conv_params(key, in_ch, out_ch):
    """Deterministic synthetic params matching the PyTorch module's shapes."""
    mid = in_ch // 2                     # nn.Conv2d(in_ch, in_ch // 2, 3, padding=1)
    k = jax.random.split(key, 6)

    def conv_init(k_w, cin, cout):
        fan_in = cin * 3 * 3
        bound = 1.0 / jnp.sqrt(fan_in)
        kw, kb = jax.random.split(k_w)
        w = jax.random.uniform(kw, (3, 3, cin, cout), jnp.float32, -bound, bound)
        b = jax.random.uniform(kb, (cout,), jnp.float32, -bound, bound)
        return w, b

    w1, b1 = conv_init(k[0], in_ch, mid)
    w2, b2 = conv_init(k[1], mid, out_ch)
    # BN defaults (running_mean=0, running_var=1); perturb gamma/beta with
    # independent keys so the BN path is actually exercised.
    return dict(
        w1=w1, b1=b1,
        g1=1.0 + 0.1 * jax.random.normal(k[2], (mid,), jnp.float32),
        be1=0.1 * jax.random.normal(k[3], (mid,), jnp.float32),
        m1=jnp.zeros((mid,), jnp.float32), v1=jnp.ones((mid,), jnp.float32),
        w2=w2, b2=b2,
        g2=1.0 + 0.1 * jax.random.normal(k[4], (out_ch,), jnp.float32),
        be2=0.1 * jax.random.normal(k[5], (out_ch,), jnp.float32),
        m2=jnp.zeros((out_ch,), jnp.float32), v2=jnp.ones((out_ch,), jnp.float32),
    )


if __name__ == "__main__":
    key = jax.random.PRNGKey(0)
    k_x, k_p = jax.random.split(key)

    N, in_ch, out_ch, H, W = 2, 4, 8, 16, 16
    x = jax.random.normal(k_x, (N, in_ch, H, W), jnp.float32)   # NCHW like PyTorch
    params = init_double_conv_params(k_p, in_ch, out_ch)

    out = double_conv_forward(params, x)
    out = jax.block_until_ready(out)

    assert out.shape == (N, out_ch, H, W), out.shape
    assert bool(jnp.all(out >= 0.0))                             # ReLU output

    ref = _reference_forward(params, x)
    assert bool(jnp.allclose(out, ref, rtol=5e-2, atol=5e-2)), (
        float(jnp.max(jnp.abs(out - ref))))

    print("KERNEL_OK")
</pallas_src>

<mosaic_0001>
module attributes {stable_mosaic.version = 11 : i64} {
  func.func @_double_conv_kernel(%arg0: i32, %arg1: memref<1x16x64xf32, #tpu.memory_space<vmem>>, %arg2: memref<3x64x32xbf16, #tpu.memory_space<vmem>>, %arg3: memref<1x32xf32, #tpu.memory_space<vmem>>, %arg4: memref<1x32xf32, #tpu.memory_space<vmem>>, %arg5: memref<3x32x128xbf16, #tpu.memory_space<vmem>>, %arg6: memref<1x128xf32, #tpu.memory_space<vmem>>, %arg7: memref<1x128xf32, #tpu.memory_space<vmem>>, %arg8: memref<1x16x128xf32, #tpu.memory_space<vmem>>) attributes {dimension_semantics = [#tpu.dimension_semantics<parallel>], iteration_bounds = array<i64: 2>, scalar_prefetch = 0 : i64, scratch_operands = 0 : i64, tpu.core_type = #tpu.core_type<tc>, window_params = [{transform_indices = @transform_0, window_bounds = array<i64: 1, 16, 64>}, {pipeline_mode = #tpu.pipeline_mode<synchronous>, transform_indices = @transform_1, window_bounds = array<i64: 3, 64, 32>}, {pipeline_mode = #tpu.pipeline_mode<synchronous>, transform_indices = @transform_2, window_bounds = array<i64: 1, 32>}, {pipeline_mode = #tpu.pipeline_mode<synchronous>, transform_indices = @transform_3, window_bounds = array<i64: 1, 32>}, {pipeline_mode = #tpu.pipeline_mode<synchronous>, transform_indices = @transform_4, window_bounds = array<i64: 3, 32, 128>}, {pipeline_mode = #tpu.pipeline_mode<synchronous>, transform_indices = @transform_5, window_bounds = array<i64: 1, 128>}, {pipeline_mode = #tpu.pipeline_mode<synchronous>, transform_indices = @transform_6, window_bounds = array<i64: 1, 128>}, {transform_indices = @transform_7, window_bounds = array<i64: 1, 16, 128>}]} {
    %c0 = arith.constant 0 : index
    %c0_0 = arith.constant 0 : index
    %c0_1 = arith.constant 0 : index
    %0 = vector.load %arg1[%c0, %c0_0, %c0_1] : memref<1x16x64xf32, #tpu.memory_space<vmem>>, vector<1x16x64xf32>
    %1 = vector.shape_cast %0 : vector<1x16x64xf32> to vector<16x64xf32>
    %cst = arith.constant 0.000000e+00 : f32
    %2 = vector.broadcast %cst : f32 to vector<1x64xf32>
    %3 = tpu.concatenate %2, %1, %2 in 0 : vector<1x64xf32>, vector<16x64xf32>, vector<1x64xf32> -> vector<18x64xf32>
    %cst_2 = arith.constant 0.000000e+00 : f32
    %4 = vector.broadcast %cst_2 : f32 to vector<16x32xf32>
    %5 = vector.extract_strided_slice %3 {offsets = [0, 0], sizes = [16, 64], strides = [1, 1]} : vector<18x64xf32> to vector<16x64xf32>
    %6 = arith.truncf %5 : vector<16x64xf32> to vector<16x64xbf16>
    %c0_3 = arith.constant 0 : index
    %c0_4 = arith.constant 0 : index
    %c0_5 = arith.constant 0 : index
    %7 = vector.load %arg2[%c0_3, %c0_4, %c0_5] : memref<3x64x32xbf16, #tpu.memory_space<vmem>>, vector<1x64x32xbf16>
    %8 = vector.shape_cast %7 : vector<1x64x32xbf16> to vector<64x32xbf16>
    %cst_6 = arith.constant dense<0.000000e+00> : vector<16x32xf32>
    %9 = tpu.matmul %6, %8, %cst_6 {dimension_numbers = #tpu.dot_dimension_numbers<[1], [0], [0], [1], [0, 0, 1, 1], [], []>} : vector<16x64xbf16>, vector<64x32xbf16>, vector<16x32xf32> -> vector<16x32xf32>
    %10 = arith.addf %4, %9 : vector<16x32xf32>
    %11 = vector.extract_strided_slice %3 {offsets = [1, 0], sizes = [16, 64], strides = [1, 1]} : vector<18x64xf32> to vector<16x64xf32>
    %12 = arith.truncf %11 : vector<16x64xf32> to vector<16x64xbf16>
    %c1 = arith.constant 1 : index
    %c0_7 = arith.constant 0 : index
    %c0_8 = arith.constant 0 : index
    %13 = vector.load %arg2[%c1, %c0_7, %c0_8] : memref<3x64x32xbf16, #tpu.memory_space<vmem>>, vector<1x64x32xbf16>
    %14 = vector.shape_cast %13 : vector<1x64x32xbf16> to vector<64x32xbf16>
    %cst_9 = arith.constant dense<0.000000e+00> : vector<16x32xf32>
    %15 = tpu.matmul %12, %14, %cst_9 {dimension_numbers = #tpu.dot_dimension_numbers<[1], [0], [0], [1], [0, 0, 1, 1], [], []>} : vector<16x64xbf16>, vector<64x32xbf16>, vector<16x32xf32> -> vector<16x32xf32>
    %16 = arith.addf %10, %15 : vector<16x32xf32>
    %17 = vector.extract_strided_slice %3 {offsets = [2, 0], sizes = [16, 64], strides = [1, 1]} : vector<18x64xf32> to vector<16x64xf32>
    %18 = arith.truncf %17 : vector<16x64xf32> to vector<16x64xbf16>
    %c2 = arith.constant 2 : index
    %c0_10 = arith.constant 0 : index
    %c0_11 = arith.constant 0 : index
    %19 = vector.load %arg2[%c2, %c0_10, %c0_11] : memref<3x64x32xbf16, #tpu.memory_space<vmem>>, vector<1x64x32xbf16>
    %20 = vector.shape_cast %19 : vector<1x64x32xbf16> to vector<64x32xbf16>
    %cst_12 = arith.constant dense<0.000000e+00> : vector<16x32xf32>
    %21 = tpu.matmul %18, %20, %cst_12 {dimension_numbers = #tpu.dot_dimension_numbers<[1], [0], [0], [1], [0, 0, 1, 1], [], []>} : vector<16x64xbf16>, vector<64x32xbf16>, vector<16x32xf32> -> vector<16x32xf32>
    %22 = arith.addf %16, %21 : vector<16x32xf32>
    %c0_13 = arith.constant 0 : index
    %c0_14 = arith.constant 0 : index
    %23 = vector.load %arg3[%c0_13, %c0_14] : memref<1x32xf32, #tpu.memory_space<vmem>>, vector<1x32xf32>
    %24 = vector.broadcast %23 : vector<1x32xf32> to vector<16x32xf32>
    %25 = arith.mulf %22, %24 : vector<16x32xf32>
    %c0_15 = arith.constant 0 : index
    %c0_16 = arith.constant 0 : index
    %26 = vector.load %arg4[%c0_15, %c0_16] : memref<1x32xf32, #tpu.memory_space<vmem>>, vector<1x32xf32>
    %27 = vector.broadcast %26 : vector<1x32xf32> to vector<16x32xf32>
    %28 = arith.addf %25, %27 : vector<16x32xf32>
    %cst_17 = arith.constant 0.000000e+00 : f32
    %29 = vector.broadcast %cst_17 : f32 to vector<16x32xf32>
    %30 = arith.maximumf %28, %29 : vector<16x32xf32>
    %cst_18 = arith.constant 0.000000e+00 : f32
    %31 = vector.broadcast %cst_18 : f32 to vector<1x32xf32>
    %32 = tpu.concatenate %31, %30, %31 in 0 : vector<1x32xf32>, vector<16x32xf32>, vector<1x32xf32> -> vector<18x32xf32>
    %cst_19 = arith.constant 0.000000e+00 : f32
    %33 = vector.broadcast %cst_19 : f32 to vector<16x128xf32>
    %34 = vector.extract_strided_slice %32 {offsets = [0, 0], sizes = [16, 32], strides = [1, 1]} : vector<18x32xf32> to vector<16x32xf32>
    %35 = arith.truncf %34 : vector<16x32xf32> to vector<16x32xbf16>
    %c0_20 = arith.constant 0 : index
    %c0_21 = arith.constant 0 : index
    %c0_22 = arith.constant 0 : index
    %36 = vector.load %arg5[%c0_20, %c0_21, %c0_22] : memref<3x32x128xbf16, #tpu.memory_space<vmem>>, vector<1x32x128xbf16>
    %37 = vector.shape_cast %36 : vector<1x32x128xbf16> to vector<32x128xbf16>
    %cst_23 = arith.constant dense<0.000000e+00> : vector<16x128xf32>
    %38 = tpu.matmul %35, %37, %cst_23 {dimension_numbers = #tpu.dot_dimension_numbers<[1], [0], [0], [1], [0, 0, 1, 1], [], []>} : vector<16x32xbf16>, vector<32x128xbf16>, vector<16x128xf32> -> vector<16x128xf32>
    %39 = arith.addf %33, %38 : vector<16x128xf32>
    %40 = vector.extract_strided_slice %32 {offsets = [1, 0], sizes = [16, 32], strides = [1, 1]} : vector<18x32xf32> to vector<16x32xf32>
    %41 = arith.truncf %40 : vector<16x32xf32> to vector<16x32xbf16>
    %c1_24 = arith.constant 1 : index
    %c0_25 = arith.constant 0 : index
    %c0_26 = arith.constant 0 : index
    %42 = vector.load %arg5[%c1_24, %c0_25, %c0_26] : memref<3x32x128xbf16, #tpu.memory_space<vmem>>, vector<1x32x128xbf16>
    %43 = vector.shape_cast %42 : vector<1x32x128xbf16> to vector<32x128xbf16>
    %cst_27 = arith.constant dense<0.000000e+00> : vector<16x128xf32>
    %44 = tpu.matmul %41, %43, %cst_27 {dimension_numbers = #tpu.dot_dimension_numbers<[1], [0], [0], [1], [0, 0, 1, 1], [], []>} : vector<16x32xbf16>, vector<32x128xbf16>, vector<16x128xf32> -> vector<16x128xf32>
    %45 = arith.addf %39, %44 : vector<16x128xf32>
    %46 = vector.extract_strided_slice %32 {offsets = [2, 0], sizes = [16, 32], strides = [1, 1]} : vector<18x32xf32> to vector<16x32xf32>
    %47 = arith.truncf %46 : vector<16x32xf32> to vector<16x32xbf16>
    %c2_28 = arith.constant 2 : index
    %c0_29 = arith.constant 0 : index
    %c0_30 = arith.constant 0 : index
    %48 = vector.load %arg5[%c2_28, %c0_29, %c0_30] : memref<3x32x128xbf16, #tpu.memory_space<vmem>>, vector<1x32x128xbf16>
    %49 = vector.shape_cast %48 : vector<1x32x128xbf16> to vector<32x128xbf16>
    %cst_31 = arith.constant dense<0.000000e+00> : vector<16x128xf32>
    %50 = tpu.matmul %47, %49, %cst_31 {dimension_numbers = #tpu.dot_dimension_numbers<[1], [0], [0], [1], [0, 0, 1, 1], [], []>} : vector<16x32xbf16>, vector<32x128xbf16>, vector<16x128xf32> -> vector<16x128xf32>
    %51 = arith.addf %45, %50 : vector<16x128xf32>
    %c0_32 = arith.constant 0 : index
    %c0_33 = arith.constant 0 : index
    %52 = vector.load %arg6[%c0_32, %c0_33] : memref<1x128xf32, #tpu.memory_space<vmem>>, vector<1x128xf32>
    %53 = vector.broadcast %52 : vector<1x128xf32> to vector<16x128xf32>
    %54 = arith.mulf %51, %53 : vector<16x128xf32>
    %c0_34 = arith.constant 0 : index
    %c0_35 = arith.constant 0 : index
    %55 = vector.load %arg7[%c0_34, %c0_35] : memref<1x128xf32, #tpu.memory_space<vmem>>, vector<1x128xf32>
    %56 = vector.broadcast %55 : vector<1x128xf32> to vector<16x128xf32>
    %57 = arith.addf %54, %56 : vector<16x128xf32>
    %cst_36 = arith.constant 0.000000e+00 : f32
    %58 = vector.broadcast %cst_36 : f32 to vector<16x128xf32>
    %59 = arith.maximumf %57, %58 : vector<16x128xf32>
    %c0_37 = arith.constant 0 : index
    %c0_38 = arith.constant 0 : index
    %c0_39 = arith.constant 0 : index
    %60 = vector.load %arg8[%c0_37, %c0_38, %c0_39] : memref<1x16x128xf32, #tpu.memory_space<vmem>>, vector<1x16x128xf32>
    %61 = vector.shape_cast %60 : vector<1x16x128xf32> to vector<16x128xf32>
    %62 = vector.shape_cast %59 : vector<16x128xf32> to vector<1x16x128xf32>
    tpu.vector_store %arg8[%c0_37, %c0_38, %c0_39], %62 {strides = array<i32>} : memref<1x16x128xf32, #tpu.memory_space<vmem>>, vector<1x16x128xf32>,
    return
  }
  func.func @transform_0(%arg0: i32) -> (i32, i32, i32) {
    %c0_i32 = arith.constant 0 : i32
    %c0_i32_0 = arith.constant 0 : i32
    %c0_i32_1 = arith.constant 0 : i32
    return %arg0, %c0_i32, %c0_i32_0 : i32, i32, i32
  }
  func.func @transform_1(%arg0: i32) -> (i32, i32, i32) {
    %c0_i32 = arith.constant 0 : i32
    %c0_i32_0 = arith.constant 0 : i32
    %c0_i32_1 = arith.constant 0 : i32
    %c0_i32_2 = arith.constant 0 : i32
    return %c0_i32, %c0_i32_0, %c0_i32_1 : i32, i32, i32
  }
  func.func @transform_2(%arg0: i32) -> (i32, i32) {
    %c0_i32 = arith.constant 0 : i32
    %c0_i32_0 = arith.constant 0 : i32
    %c0_i32_1 = arith.constant 0 : i32
    return %c0_i32, %c0_i32_0 : i32, i32
  }
  func.func @transform_3(%arg0: i32) -> (i32, i32) {
    %c0_i32 = arith.constant 0 : i32
    %c0_i32_0 = arith.constant 0 : i32
    %c0_i32_1 = arith.constant 0 : i32
    return %c0_i32, %c0_i32_0 : i32, i32
  }
  func.func @transform_4(%arg0: i32) -> (i32, i32, i32) {
    %c0_i32 = arith.constant 0 : i32
    %c0_i32_0 = arith.constant 0 : i32
    %c0_i32_1 = arith.constant 0 : i32
    %c0_i32_2 = arith.constant 0 : i32
    return %c0_i32, %c0_i32_0, %c0_i32_1 : i32, i32, i32
  }
  func.func @transform_5(%arg0: i32) -> (i32, i32) {
    %c0_i32 = arith.constant 0 : i32
    %c0_i32_0 = arith.constant 0 : i32
    %c0_i32_1 = arith.constant 0 : i32
    return %c0_i32, %c0_i32_0 : i32, i32
  }
  func.func @transform_6(%arg0: i32) -> (i32, i32) {
    %c0_i32 = arith.constant 0 : i32
    %c0_i32_0 = arith.constant 0 : i32
    %c0_i32_1 = arith.constant 0 : i32
    return %c0_i32, %c0_i32_0 : i32, i32
  }
  func.func @transform_7(%arg0: i32) -> (i32, i32, i32) {
    %c0_i32 = arith.constant 0 : i32
    %c0_i32_0 = arith.constant 0 : i32
    %c0_i32_1 = arith.constant 0 : i32
    return %arg0, %c0_i32, %c0_i32_0 : i32, i32, i32
  }
}

</mosaic_0001>

<bundles_post_ra>
// kernel: tpu_custom_call.1
= control target key start
LH: loop header
LB: loop body
LE: loop exit
PB: predicated region body
PF: predicated region fallthrough
CT: control target
= control target key end

     0   :  { %12 = vsyncpa [#allocation3], 0  ;;  %s1149_s0 = inlined_call_operand.vmem [shape: f32[2,16,64], index: 0, kind: input, shape index: {}]   ;;  %s1150_s1 = inlined_call_operand.vmem [shape: bf16[3,64,32], index: 1, kind: input, shape index: {}]   ;;  %s1151_s2 = inlined_call_operand.vmem [shape: f32[1,32], index: 2, kind: input, shape index: {}]   ;;  %s1152_s3 = inlined_call_operand.vmem [shape: f32[1,32], index: 3, kind: input, shape index: {}]   ;;  %s1153_s4 = inlined_call_operand.vmem [shape: bf16[3,32,128], index: 4, kind: input, shape index: {}]   ;;  %s1154_s5 = inlined_call_operand.vmem [shape: f32[1,128], index: 5, kind: input, shape index: {}]   ;;  %s1155_s6 = inlined_call_operand.vmem [shape: f32[1,128], index: 6, kind: input, shape index: {}]   ;;  %s1156_s7 = inlined_call_operand.hbm [shape: f32[2,16,128], index: 7, kind: output, shape index: {}]  }
   0x1   :  { %14 = vsyncpa [#allocation3 + $0x1], 0  ;;  %s988_s24 = smov 0   ;;  %s990_s25 = smov 0  }
   0x2   :  { %s992_s26 = smov 0   ;;  %s994_s27 = smov 0  }
   0x3 LB: > { %s1009_s28 = sadd.s32 4294967295, %s944_s27   ;;  %s703_s29 = sadd.s32 4294967294, %s944_s27   ;;  %s944_s27 = sphi %s994_s27, %s1162_s27   ;;  %s940_s26 = sphi %s992_s26, %s1161_s26   ;;  %s936_s25 = sphi %s990_s25, %s1160_s25   ;;  %s932_s24 = sphi %s988_s24, %s1159_s24  }
   0x4   : > { %s1013_s30 = sadd.s32 1, %s944_s27   ;;  %s179_s8 = sadd.s32 1, %s940_s26 }
   0x5   : > { %s176_s9 = ssub.s32 %s944_s27, %s1013_s30  ;;  %p189_p0 = scmp.ne.s32.totalorder %s940_s26, %s936_s25 }
   0x6   : > { %p177_p1 = scmp.eq.s32.totalorder %s176_s9, 0  ;;  %p190_p2 = scmp.eq.s32.totalorder %s1009_s28, 1 }
   0x7   : > { %p195_p3 = scmp.ne.s32.totalorder %s936_s25, %s932_s24  ;;  %p196_p4 = scmp.eq.s32.totalorder %s703_s29, 1 }
   0x8   : > { %s1024_s10 = scalar_select %p177_p1, %s940_s26, %s179_s8  }
   0x9   : > { %p1026_p5 = por %p190_p2, %p189_p0  ;;  %p1030_p6 = por %p196_p4, %p195_p3 }
   0xa   : > { %p706_p7 = scmp.ge.s32.totalorder %s944_s27, 1  ;;  %p240_p8 = scmp.lt.s32.totalorder %s944_s27, 3 }
   0xc   : > { %p241_p9 = pnand %p706_p7, %p240_p8 }
   0xd   : > { %p272_p10 = scmp.lt.s32.totalorder (!%p241_p9), %s1009_s28, 1  ;;  %s269_s18 = sand.u32 (!%p241_p9), 1, %s936_s25  }
   0xe   : > { %244 = sbr.rel (%p241_p9) target bundleno = 366 (0x16e), region = 48  ;;  %s707_s21 = sshll.u32 (!%p241_p9), %s269_s18, 4 }
   0xf   : > { %s836_s22 = sshll.u32 (!%p241_p9), %s1009_s28, 4  ;;  %s902_s20 = scalar_lea.hbm (!%p241_p9), %s1156_s7, 32 }
  0x10   : > { %s637_s8 = scalar_lea.hbm (!%p241_p9), %s1156_s7, %s836_s22 }
  0x11   : > { %s640_s14 = sshll.u32 (!%p241_p9), %s637_s8, 4  ;;  %s641_s14 = int_to_ptr.hbm [resolvable:$true] %s640_s14 }
  0x12   : > { %s896_s15 = sshra.s32 (!%p241_p9), %s641_s14, 4  ;;  %s897_s15 = int_to_ptr.hbm [resolvable:$true] %s896_s15 }
  0x13   : > { %v821_v0 = vld [vmem:[%s1150_s1 + $0x18] sm:$0xff]  ;;  %v820_v3 = vld [vmem:[%s1150_s1 + $0x10] sm:$0xff]  ;;  %s273_s23 = scalar_select %p272_p10, %s1009_s28, 1  ;;  %v819_v6 = vld [vmem:[%s1150_s1 + $0x8] sm:$0xff]  ;;  %vm282_vm0 = vcmask 1040384   ;;  %vm416_vm1 = vcmask 1046528  }
  0x14   : > { %v829_v1 = vld [vmem:[%s1150_s1 + $0x58] sm:$0xff]  ;;  %395 = vmatpush.bf16.msra.mxu1 %v821_v0  ;;  %v828_v4 = vld [vmem:[%s1150_s1 + $0x50] sm:$0xff]  ;;  %v827_v7 = vld [vmem:[%s1150_s1 + $0x48] sm:$0xff]  ;;  %vm347_vm2 = vcmask 523264   ;;  %vm310_vm3 = vsmask.f32 7424  ;;  %p903_p0 = scmp.lt.s32.totalorder %s897_s15, %s1156_s7 }
  0x15   : > { %v825_v2 = vld [vmem:[%s1150_s1 + $0x38] sm:$0xff]  ;;  %451 = vmatpush.bf16.msra.mxu2 %v829_v1  ;;  %v824_v5 = vld [vmem:[%s1150_s1 + $0x30] sm:$0xff]  ;;  %s817_s9 = sshll.u32 %s273_s23, 4  ;;  %v823_v10 = vld [vmem:[%s1150_s1 + $0x28] sm:$0xff]  ;;  %vm522_vm4 = vcmask 261120   ;;  %s626_s28 = scalar_lea.sflag [#allocation3], %s269_s18 }
  0x16   : > { %355 = vmatpush.bf16.msra.mxu0 %v825_v2  ;;  %s276_s17 = scalar_lea.vmem %s1149_s0, %s817_s9  ;;  %v818_v16 = vld [vmem:[%s1150_s1] sm:$0xff]  ;;  %v835_v31 = vld [vmem:[%s1153_s4 + $0x28] sm:$0xff]  ;;  %v833_v32 = vld [vmem:[%s1153_s4 + $0x18] sm:$0xff]  ;;  %s271_s9 = scalar_lea.vmem [#allocation2], %s707_s21 }
  0x17   : > { %v278_v8 = vld [vmem:[%s276_s17] sm:$0xff]  ;;  %v279_v9 = vld [vmem:[%s276_s17 + $0x8] sm:$0xff]  ;;  %532 = vmatpush.bf16.msra.mxu3 %v833_v32  ;;  %v832_v34 = vld [vmem:[%s1153_s4 + $0x10] sm:$0xff]  ;;  %s638_s13 = sshll.u32 %s271_s9, 4  ;;  %s898_s16 = scalar_lea.hbm %s897_s15, 16  ;;  %s639_s13 = int_to_ptr.vmem [resolvable:$true] %s638_s13 }
  0x18   : > { %396 = vmatpush.bf16.msra.mxu1 %v820_v3  ;;  %v283_v11 = vrot.slane %v278_v8, 7  ;;  %v284_v12 = vrot.slane %v279_v9, 7  ;;  %v826_v17 = vld [vmem:[%s1150_s1 + $0x40] sm:$0xff]  ;;  %v831_v38 = vld [vmem:[%s1153_s4 + $0x8] sm:$0xff]  ;;  %p899_p11 = scmp.ne.s32.totalorder %s897_s15, %s898_s16  ;;  %p904_p1 = scmp.lt.s32.totalorder %s902_s20, %s898_s16 }
  0x19   : > { %452 = vmatpush.bf16.msra.mxu2 %v828_v4  ;;  %v822_v20 = vld [vmem:[%s1150_s1 + $0x20] sm:$0xff] }
  0x1a   : > { %356 = vmatpush.bf16.msra.mxu0 %v824_v5  ;;  %v285_v13 = vsel %vm282_vm0, %v283_v11, %v284_v12  ;;  %v289_v14 = vsel %vm282_vm0, 0.0, %v283_v11  ;;  %v290_v15 = vsel %vm282_vm0, %v284_v12, 0.0  ;;  %v834_v33 = vld [vmem:[%s1153_s4 + $0x20] sm:$0xff]  ;;  %p900_p12 = pnand %p899_p11, %p1026_p5  ;;  %p905_p2 = por %p904_p1, %p903_p0 }
  0x1b   : > { %v291_v18 = vpack.c.bf16 %v285_v13, %v289_v14  ;;  %v300_v19 = vpack.c.bf16 %v290_v15, %v290_v15  ;;  %533 = vmatpush.bf16.msra.mxu3 %v832_v34  ;;  %v878_v39 = vld [vmem:[%s1151_s2] ss:$0 sm:$0xff] }
  0x1c   : > { %397 = vmatpush.bf16.msra.mxu1 %v819_v6  ;;  %v830_v40 = vld [vmem:[%s1153_s4] sm:$0xff]  ;;  %p901_p13 = pneg %p900_p12 }
  0x1d   : > { %453 = vmatpush.bf16.msra.mxu2 %v827_v7  ;;  %v417_v21 = vrot.slane %v291_v18, 1  ;;  %v418_v22 = vrot.slane %v300_v19, 1  ;;  %v312_v23 = vshrl.u32 %v291_v18, 16  ;;  %v314_v24 = vshll.u32 %v291_v18, 16  ;;  %v879_v44 = vld [vmem:[%s1152_s3] ss:$0 sm:$0xff] }
  0x1e   : > { %357 = vmatpush.bf16.msra.mxu0 %v823_v10  ;;  %v319_v25 = vshll.u32 %v300_v19, 16  ;;  %v880_v13 = vld [vmem:[%s1154_s5] ss:$0 sm:$0xff]  ;;  %p906_p3 = pnand %p905_p2, %p901_p13 }
  0x1f   : > { %v419_v26 = vsel %vm416_vm1, %v417_v21, %v418_v22  ;;  %v316_v27 = vrot.slane %v314_v24, 1  ;;  %560 = vmatpush.bf16.msrb.mxu3 %v831_v38  ;;  %v881_v15 = vld [vmem:[%s1155_s6] ss:$0 sm:$0xff] }
  0x20   : > { %398 = vmatpush.bf16.msra.mxu1 %v818_v16  ;;  %v321_v28 = vrot.slane %v319_v25, 1 }
  0x21   : > { %454 = vmatpush.bf16.msra.mxu2 %v826_v17  ;;  %v317_v29 = vor.u32 %v316_v27, %v312_v23 }
  0x22   : > { %358 = vmatpush.bf16.msra.mxu0 %v822_v20 }
  0x23   : > { %751 = vmatmul.msk.bf16.vlgmr.msra.gmra.mxu1 %vm347_vm2, %v291_v18  ;;  %v322_v30 = vsel %vm310_vm3, %v317_v29, %v321_v28  ;;  %561 = vmatpush.bf16.msrb.mxu3 %v830_v40 }
  0x24   : > { %776 = vmatmul.msk.bf16.vlgmr.msra.gmra.mxu2 %vm347_vm2, %v419_v26 }
  0x25   : > { %734 = vmatmul.msk.bf16.vlgmr.msra.gmra.mxu0 %vm347_vm2, %v322_v30 }
  0x26   : > { %599 = vmatpush.bf16.msrb.mxu0 %v835_v31 }
  0x2a   : > { %600 = vmatpush.bf16.msrb.mxu0 %v834_v33 }
  0xa0   : > { %v400_v35 = vpop.f32.mrf.mxu1 }
  0xa2   : > { %v360_v36 = vpop.f32.mrf.mxu0 }
  0xa3   : > { %v401_v37 = vadd.f32 %v400_v35, %v360_v36 }
  0xa7   : > { %v456_v41 = vpop.f32.mrf.mxu2 }
  0xa8   : > { %v461_v42 = vadd.f32 %v456_v41, %v401_v37  ;;  %v402_v46 = vpop.f32.mrf.mxu1 }
  0xaa   : > { %v467_v43 = vmul.f32 %v878_v39, %v461_v42  ;;  %v362_v45 = vpop.f32.mrf.mxu0 }
  0xab   : > { %v403_v48 = vadd.f32 %v402_v46, %v362_v45 }
  0xac   : > { %v473_v47 = vadd.f32 %v879_v44, %v467_v43 }
  0xae   : > { %v475_v51 = vmax.f32 %v473_v47, 0.0 }
  0xaf   : > { %v458_v49 = vpop.f32.mrf.mxu2 }
  0xb0   : > { %v462_v50 = vadd.f32 %v458_v49, %v403_v48  ;;  %v479_v54 = vrot.slane %v475_v51, 7 }
  0xb2   : > { %v468_v52 = vmul.f32 %v878_v39, %v462_v50  ;;  %v485_v57 = vsel %vm282_vm0, 0.0, %v479_v54 }
  0xb4   : > { %v474_v53 = vadd.f32 %v879_v44, %v468_v52 }
  0xb6   : > { %v476_v55 = vmax.f32 %v474_v53, 0.0 }
  0xb8   : > { %v480_v56 = vrot.slane %v476_v55, 7 }
  0xba   : > { %v481_v58 = vsel %vm282_vm0, %v479_v54, %v480_v56  ;;  %v486_v59 = vsel %vm282_vm0, %v480_v56, 0.0 }
  0xbb   : > { %v487_v60 = vpack.c.bf16 %v481_v58, %v485_v57  ;;  %v492_v61 = vpack.c.bf16 %v486_v59, %v486_v59 }
  0xbd   : > { %v575_v62 = vrot.slane %v487_v60, 1  ;;  %v576_v63 = vrot.slane %v492_v61, 1  ;;  %v501_v0 = vshll.u32 %v487_v60, 16  ;;  %v506_v1 = vshll.u32 %v492_v61, 16 }
  0xbe   : > { %v499_v3 = vshrl.u32 %v487_v60, 16 }
  0xbf   : > { %v577_v2 = vsel %vm416_vm1, %v575_v62, %v576_v63  ;;  %v503_v4 = vrot.slane %v501_v0, 1  ;;  %v508_v6 = vrot.slane %v506_v1, 1 }
  0xc0   : > { %811 = vmatmul.msk.bf16.vlgmr.msrb.gmra.mxu0 %vm522_vm4, %v577_v2 }
  0xc1   : > { %v504_v5 = vor.u32 %v503_v4, %v499_v3 }
  0xc3   : > { %v509_v7 = vsel %vm310_vm3, %v504_v5, %v508_v6 }
  0xc4   : > { %789 = vmatmul.msk.bf16.vlgmr.msra.gmra.mxu3 %vm522_vm4, %v509_v7 }
  0xd4   : > { %798 = vmatmul.msk.bf16.vlgmr.msrb.gmra.mxu3 %vm522_vm4, %v487_v60 }
 0x13d   : > { %v602_v10 = vpop.f32.mrf.mxu0 }
 0x145   : > { %v604_v21 = vpop.f32.mrf.mxu0 }
 0x147   : > { %v535_v8 = vpop.f32.mrf.mxu3 }
 0x14f   : > { %v537_v9 = vpop.f32.mrf.mxu3 }
 0x157   : > { %v563_v11 = vpop.f32.mrf.mxu3 }
 0x158   : > { %v564_v12 = vadd.f32 %v563_v11, %v535_v8 }
 0x15a   : > { %v607_v14 = vadd.f32 %v602_v10, %v564_v12 }
 0x15c   : > { %v613_v16 = vmul.f32 %v880_v13, %v607_v14 }
 0x15e   : > { %v619_v17 = vadd.f32 %v881_v15, %v613_v16 }
 0x15f   : > { %v565_v18 = vpop.f32.mrf.mxu3 }
 0x160   : > { %v621_v19 = vmax.f32 %v619_v17, 0.0  ;;  %v566_v20 = vadd.f32 %v565_v18, %v537_v9 }
 0x162   : > { %623 = vst [vmem:[%s271_s9] sm:$0xff] %v621_v19  ;;  %v608_v22 = vadd.f32 %v604_v21, %v566_v20 }
 0x164   : > { %v614_v23 = vmul.f32 %v880_v13, %v608_v22 }
 0x166   : > { %v620_v24 = vadd.f32 %v881_v15, %v614_v23 }
 0x168   : > { %v622_v25 = vmax.f32 %v620_v24, 0.0 }
 0x16a   : > { %624 = vst [vmem:[%s271_s9 + $0x8] sm:$0xff] %v622_v25 }
 0x16b   : > { %909 = shalt.err (!%p906_p3)
}
 0x16c   : > { %s946_s18 = smov 128   ;;  %s947_s23 = smov 8  }
 0x16d   : > { %837 = dma.vmem_to_hbm [thread:$0]  (%p1026_p5), %s639_s13, 256, %s641_s14, %s626_s28, %s946_s18, %s946_s18, %s947_s23  }
 0x16e PF: > { %p843_p4 = scmp.ge.s32.totalorder %s944_s27, 2  ;;  %s655_s29 = sand.u32 1, %s932_s24  }
 0x16f   : > { %s656_s8 = scalar_lea.sflag [#allocation3], %s655_s29 }
 0x170   : > { %p840_p7 = pnand %p843_p4, %p1030_p6 }
 0x172   : > { %p841_p8 = pneg %p840_p7 }
 0x174   : > { %927 = dma.done.wait (%p841_p8), %s656_s8, 256  }
 0x175   : > { %929 = vsyncadd (%p841_p8), %s656_s8, 4294967040  ;;  %p17_p9 = scmp.ge.s32.totalorder %s1013_s30, 4   ;;  %s1159_s24 = smov %s936_s25 }
 0x176   : > { %s1160_s25 = smov %s940_s26  ;;  %s1161_s26 = smov %s1024_s10 }
 0x177   : > { %s1162_s27 = smov %s1013_s30  ;;  %19 = sbr.rel (!%p17_p9) target bundleno = 3 (0x3), region = 87 }
 0x17c   :  { %662 = vsyncpa [#allocation3], 1 }
 0x17d   :  { %664 = vsyncpa [#allocation3 + $0x1], 1 }

</bundles_post_ra>
